<compile_context>
chip_gen: v5e
topology: v5e:2x2
jax: 0.10.0
libtpu: 0.0.40
codegen_flags: <defaults>
</compile_context>

<pallas_src>
import math
import functools

import jax
import jax.numpy as jnp
from jax.experimental import pallas as pl
from jax.experimental.pallas import tpu as pltpu


def _round_up(x, m):
    return (x + m - 1) // m * m


# ----------------------------------------------------------------------------
# Kernel: one MXU matmul + bias add + one lane-dense store.
# ----------------------------------------------------------------------------
def _fused_recon_kernel(hflat_ref, wbig_ref, bias_ref, o_ref, *, precision):
    # hflat_ref: (block_b, K)   wbig_ref: (K, P)
    # bias_ref:  (1, P)         o_ref:    (block_b, P)
    acc = jax.lax.dot_general(
        hflat_ref[...],
        wbig_ref[...],
        dimension_numbers=(((1,), (0,)), ((), ())),  # contract last(lhs) x first(rhs)
        preferred_element_type=jnp.float32,
        precision=precision,
    )
    o_ref[...] = acc + bias_ref[...]


# ----------------------------------------------------------------------------
# One-time weight packing (hoisted out of the per-step path).
# Vectorized construction: no chained .at[].set() scatters.
# ----------------------------------------------------------------------------
def pack_reconstructor_params(weight, cat_weights, cat_biases,
                              d_numerical, categories, d_token,
                              dtype=jnp.float32):
    n_cat = len(categories)
    total_cat = int(sum(categories))
    n_out = d_numerical + total_cat
    D = d_token
    P = _round_up(max(n_out, 1), 128)

    # Numerical head: token j feeds only output column j.
    #   block[j*D + k, c] = weight[j, k] if c == j else 0
    if d_numerical > 0:
        num_block = (weight.astype(jnp.float32)[:, :, None]
                     * jnp.eye(d_numerical, dtype=jnp.float32)[:, None, :])
        num_block = num_block.reshape(d_numerical * D, d_numerical)
        top = jnp.concatenate(
            [num_block, jnp.zeros((d_numerical * D, total_cat), jnp.float32)],
            axis=1)
    else:
        top = jnp.zeros((0, n_out), jnp.float32)

    # Categorical heads: block-diagonal of W_i.T.
    if n_cat > 0:
        cat_block = jax.scipy.linalg.block_diag(
            *[w.astype(jnp.float32).T for w in cat_weights])
        bottom = jnp.concatenate(
            [jnp.zeros((n_cat * D, d_numerical), jnp.float32), cat_block],
            axis=1)
    else:
        bottom = jnp.zeros((0, n_out), jnp.float32)

    w_core = jnp.concatenate([top, bottom], axis=0)          # (T*D, n_out)
    w_big = jnp.pad(w_core, ((0, 0), (0, P - n_out))).astype(dtype)

    bias_parts = [jnp.zeros((d_numerical,), jnp.float32)] + \
                 [b.astype(jnp.float32) for b in cat_biases]
    bias = jnp.concatenate(bias_parts) if n_out > 0 else jnp.zeros((0,), jnp.float32)
    bias = jnp.pad(bias, (0, P - n_out)).reshape(1, P).astype(jnp.float32)
    return w_big, bias


# ----------------------------------------------------------------------------
# Batch tile selection: VMEM-budgeted, >= 2 grid steps when B >= 16 (v7x).
# ----------------------------------------------------------------------------
def _choose_block_b(B, K, P, h_bytes):
    if B <= 8:
        return B                                   # single tiny block
    budget = 16 << 20                              # conservative: v5e scoped-VMEM default
    const_bytes = K * P * 4 + 8 * P * 4            # single-buffered W_big + bias
    per_row = 2 * K * h_bytes + 2 * P * 4          # double-buffered h block + out block
    fit = (budget - const_bytes) // max(per_row, 1)
    fit = max(8, (fit // 8) * 8)
    two_way = _round_up(pl.cdiv(B, 2), 8)          # guarantee >= 2 grid steps
    blk = min(two_way, fit, 1024)                  # 512-1024 rows ~ HBM roofline on v6e
    return max(8, blk)


# ----------------------------------------------------------------------------
# Per-step forward: one pallas_call, then slice heads back out.
# ----------------------------------------------------------------------------
@functools.partial(jax.jit, static_argnames=("d_numerical", "categories"))
def reconstructor_forward(h, w_big, bias, *, d_numerical, categories):
    B, T, D = h.shape
    n_cat = len(categories)
    assert T == d_numerical + n_cat
    K = T * D
    P = w_big.shape[1]

    h_flat = h.reshape(B, K)                       # no dtype upcast in the wrapper
    h_bytes = h_flat.dtype.itemsize
    block_b = _choose_block_b(B, K, P, h_bytes)
    grid = (pl.cdiv(B, block_b),)

    precision = (jax.lax.Precision.HIGHEST
                 if h_flat.dtype == jnp.float32 else jax.lax.Precision.DEFAULT)
    kernel = functools.partial(_fused_recon_kernel, precision=precision)

    cost = pl.CostEstimate(
        flops=2 * B * K * P,
        transcendentals=0,
        bytes_accessed=(B * K * h_bytes
                        + K * P * w_big.dtype.itemsize
                        + B * P * 4),
    )

    out = pl.pallas_call(
        kernel,
        out_shape=jax.ShapeDtypeStruct((B, P), jnp.float32),
        grid_spec=pltpu.PrefetchScalarGridSpec(
            num_scalar_prefetch=0,
            grid=grid,
            in_specs=[
                pl.BlockSpec((block_b, K), lambda i: (i, 0)),
                # grid-invariant operands: single-buffered
                pl.BlockSpec((K, P), lambda i: (0, 0),
                             pipeline_mode=pl.Buffered(1)),
                pl.BlockSpec((1, P), lambda i: (0, 0),
                             pipeline_mode=pl.Buffered(1)),
            ],
            out_specs=pl.BlockSpec((block_b, P), lambda i: (i, 0)),
        ),
        compiler_params=pltpu.CompilerParams(
            dimension_semantics=("parallel",),
        ),
        cost_estimate=cost,
    )(h_flat, w_big, bias)

    recon_x_num = out[:, :d_numerical]
    recon_x_cat = []
    off = d_numerical
    for d in categories:
        recon_x_cat.append(out[:, off:off + d])
        off += d
    return recon_x_num, recon_x_cat


# ----------------------------------------------------------------------------
# Deterministic parameter init (matches PyTorch __init__ shapes/distributions)
# ----------------------------------------------------------------------------
def xavier_uniform(key, shape, gain):
    fan_out, fan_in = shape  # PyTorch convention: (out, in)
    bound = gain * math.sqrt(6.0 / (fan_in + fan_out))
    return jax.random.uniform(key, shape, jnp.float32, -bound, bound)


def init_params(key, d_numerical, categories, d_token):
    gain = 1.0 / math.sqrt(2.0)
    keys = jax.random.split(key, 1 + 2 * len(categories))
    weight = xavier_uniform(keys[0], (d_numerical, d_token), gain)
    cat_weights, cat_biases = [], []
    for i, d in enumerate(categories):
        w = xavier_uniform(keys[1 + 2 * i], (d, d_token), gain)
        bb = 1.0 / math.sqrt(d_token)  # nn.Linear default bias init
        b = jax.random.uniform(keys[2 + 2 * i], (d,), jnp.float32, -bb, bb)
        cat_weights.append(w)
        cat_biases.append(b)
    return weight, cat_weights, cat_biases


def _check(h, weight, cat_weights, cat_biases, recon_x_num, recon_x_cat,
           d_numerical, categories):
    B = h.shape[0]
    ref_num = jnp.sum(h[:, :d_numerical, :] * weight[None], axis=-1)
    assert recon_x_num.shape == (B, d_numerical)
    assert jnp.allclose(recon_x_num, ref_num, atol=1e-4, rtol=1e-4)
    for i, d in enumerate(categories):
        x_i = h[:, d_numerical + i, :]
        ref_cat = (jnp.sum(x_i[:, None, :] * cat_weights[i][None, :, :], axis=-1)
                   + cat_biases[i])
        assert recon_x_cat[i].shape == (B, d)
        assert jnp.allclose(recon_x_cat[i], ref_cat, atol=1e-4, rtol=1e-4)


# ----------------------------------------------------------------------------
# Main
# ----------------------------------------------------------------------------
if __name__ == "__main__":
    d_numerical = 6
    categories = (3, 5, 4)
    d_token = 32
    n_tokens = d_numerical + len(categories)

    key = jax.random.PRNGKey(0)
    k_h, k_h2, k_p = jax.random.split(key, 3)

    weight, cat_weights, cat_biases = init_params(
        k_p, d_numerical, categories, d_token
    )

    # One-time packing, hoisted out of the per-step path.
    w_big, bias = pack_reconstructor_params(
        weight, cat_weights, cat_biases, d_numerical, categories, d_token,
        dtype=jnp.float32,
    )
    w_big = jax.block_until_ready(w_big)
    bias = jax.block_until_ready(bias)

    # Run 1: B = 8 (single block).
    B = 8
    h = jax.random.normal(k_h, (B, n_tokens, d_token), jnp.float32)
    recon_x_num, recon_x_cat = reconstructor_forward(
        h, w_big, bias, d_numerical=d_numerical, categories=categories,
    )
    recon_x_num = jax.block_until_ready(recon_x_num)
    recon_x_cat = [jax.block_until_ready(x) for x in recon_x_cat]
    _check(h, weight, cat_weights, cat_biases, recon_x_num, recon_x_cat,
           d_numerical, categories)

    # Run 2: B = 20 (multi-step grid + partial last block, exercises the
    # adaptive tiling / masked-output path).
    B2 = 20
    h2 = jax.random.normal(k_h2, (B2, n_tokens, d_token), jnp.float32)
    num2, cat2 = reconstructor_forward(
        h2, w_big, bias, d_numerical=d_numerical, categories=categories,
    )
    num2 = jax.block_until_ready(num2)
    cat2 = [jax.block_until_ready(x) for x in cat2]
    _check(h2, weight, cat_weights, cat_biases, num2, cat2,
           d_numerical, categories)

    print("KERNEL_OK")
</pallas_src>

<mosaic_0001>
module attributes {stable_mosaic.version = 11 : i64} {
  func.func @_fused_recon_kernel(%arg0: i32, %arg1: memref<8x288xf32, #tpu.memory_space<vmem>>, %arg2: memref<288x128xf32, #tpu.memory_space<vmem>>, %arg3: memref<1x128xf32, #tpu.memory_space<vmem>>, %arg4: memref<8x128xf32, #tpu.memory_space<vmem>>) attributes {dimension_semantics = [#tpu.dimension_semantics<parallel>], iteration_bounds = array<i64: 1>, scalar_prefetch = 0 : i64, scratch_operands = 0 : i64, tpu.core_type = #tpu.core_type<tc>, window_params = [{transform_indices = @transform_0, window_bounds = array<i64: 8, 288>}, {pipeline_mode = #tpu.pipeline_mode<synchronous>, transform_indices = @transform_1, window_bounds = array<i64: 288, 128>}, {pipeline_mode = #tpu.pipeline_mode<synchronous>, transform_indices = @transform_2, window_bounds = array<i64: 1, 128>}, {transform_indices = @transform_3, window_bounds = array<i64: 8, 128>}]} {
    %c0 = arith.constant 0 : index
    %c0_0 = arith.constant 0 : index
    %0 = vector.load %arg1[%c0, %c0_0] : memref<8x288xf32, #tpu.memory_space<vmem>>, vector<8x288xf32>
    %c0_1 = arith.constant 0 : index
    %c0_2 = arith.constant 0 : index
    %1 = vector.load %arg2[%c0_1, %c0_2] : memref<288x128xf32, #tpu.memory_space<vmem>>, vector<288x128xf32>
    %cst = arith.constant dense<0.000000e+00> : vector<8x128xf32>
    %2 = tpu.matmul %0, %1, %cst {dimension_numbers = #tpu.dot_dimension_numbers<[1], [0], [0], [1], [0, 0, 1, 1], [], []>, precision = #tpu.contract_precision<fp32>} : vector<8x288xf32>, vector<288x128xf32>, vector<8x128xf32> -> vector<8x128xf32>
    %c0_3 = arith.constant 0 : index
    %c0_4 = arith.constant 0 : index
    %3 = vector.load %arg3[%c0_3, %c0_4] : memref<1x128xf32, #tpu.memory_space<vmem>>, vector<1x128xf32>
    %4 = vector.broadcast %3 : vector<1x128xf32> to vector<8x128xf32>
    %5 = arith.addf %2, %4 : vector<8x128xf32>
    %c0_5 = arith.constant 0 : index
    %c0_6 = arith.constant 0 : index
    %6 = vector.load %arg4[%c0_5, %c0_6] : memref<8x128xf32, #tpu.memory_space<vmem>>, vector<8x128xf32>
    tpu.vector_store %arg4[%c0_5, %c0_6], %5 {strides = array<i32>} : memref<8x128xf32, #tpu.memory_space<vmem>>, vector<8x128xf32>,
    return
  }
  func.func @transform_0(%arg0: i32) -> (i32, i32) {
    %c0_i32 = arith.constant 0 : i32
    %c0_i32_0 = arith.constant 0 : i32
    return %arg0, %c0_i32 : i32, i32
  }
  func.func @transform_1(%arg0: i32) -> (i32, i32) {
    %c0_i32 = arith.constant 0 : i32
    %c0_i32_0 = arith.constant 0 : i32
    %c0_i32_1 = arith.constant 0 : i32
    return %c0_i32, %c0_i32_0 : i32, i32
  }
  func.func @transform_2(%arg0: i32) -> (i32, i32) {
    %c0_i32 = arith.constant 0 : i32
    %c0_i32_0 = arith.constant 0 : i32
    %c0_i32_1 = arith.constant 0 : i32
    return %c0_i32, %c0_i32_0 : i32, i32
  }
  func.func @transform_3(%arg0: i32) -> (i32, i32) {
    %c0_i32 = arith.constant 0 : i32
    %c0_i32_0 = arith.constant 0 : i32
    return %arg0, %c0_i32 : i32, i32
  }
}

</mosaic_0001>

<bundles_post_ra>
// kernel: reconstructor_forward.1
= control target key start
LH: loop header
LB: loop body
LE: loop exit
PB: predicated region body
PF: predicated region fallthrough
CT: control target
= control target key end

     0   :  { %vm57_vm0 = vcmask 261120   ;;  %s1623_s1 = inlined_call_operand.vmem [shape: f32[288,128], index: 1, kind: input, shape index: {}]   ;;  %s1624_s2 = inlined_call_operand.vmem [shape: f32[1,128], index: 2, kind: input, shape index: {}]   ;;  %s1625_s0 = inlined_call_operand.vmem [shape: f32[8,288], index: 0, kind: input, shape index: {}]   ;;  %s1626_s3 = inlined_call_operand.vmem [shape: f32[8,128], index: 3, kind: output, shape index: {}]  }
   0x1   :  { %v32_v0 = vld [vmem:[%s1623_s1 + $0x78] sm:$0xff]  ;;  %v31_v1 = vld [vmem:[%s1623_s1 + $0x70] sm:$0xff]  ;;  %v30_v2 = vld [vmem:[%s1623_s1 + $0x68] sm:$0xff] }
   0x2   :  { %v963_v3 = vand.u32 4294901760, %v32_v0  ;;  %v965_v4 = vand.u32 4294901760, %v31_v1  ;;  %v967_v5 = vand.u32 4294901760, %v30_v2  ;;  %v29_v6 = vld [vmem:[%s1623_s1 + $0x60] sm:$0xff]  ;;  %v28_v7 = vld [vmem:[%s1623_s1 + $0x58] sm:$0xff]  ;;  %v27_v8 = vld [vmem:[%s1623_s1 + $0x50] sm:$0xff] }
   0x3   :  { %v978_v9 = vand.u32 4294901760, %v29_v6  ;;  %v980_v10 = vand.u32 4294901760, %v28_v7  ;;  %v982_v11 = vand.u32 4294901760, %v27_v8  ;;  %v26_v12 = vld [vmem:[%s1623_s1 + $0x48] sm:$0xff]  ;;  %v25_v13 = vld [vmem:[%s1623_s1 + $0x40] sm:$0xff]  ;;  %v24_v21 = vld [vmem:[%s1623_s1 + $0x38] sm:$0xff] }
   0x4   :  { %62 = vmatpush.msra.mxu0 %v963_v3  ;;  %v992_v14 = vsub.f32 %v32_v0, %v963_v3  ;;  %v995_v15 = vsub.f32 %v31_v1, %v965_v4  ;;  %258 = vmatpush.msra.mxu3 %v963_v3  ;;  %v999_v16 = vsub.f32 %v30_v2, %v967_v5  ;;  %v1001_v17 = vand.u32 4294901760, %v26_v12  ;;  %v23_v26 = vld [vmem:[%s1623_s1 + $0x30] sm:$0xff]  ;;  %v22_v36 = vld [vmem:[%s1623_s1 + $0x28] sm:$0xff]  ;;  %v21_v42 = vld [vmem:[%s1623_s1 + $0x20] sm:$0xff] }
   0x5   :  { %v1004_v18 = vsub.f32 %v29_v6, %v978_v9  ;;  %v1007_v19 = vsub.f32 %v28_v7, %v980_v10  ;;  %v1010_v20 = vsub.f32 %v27_v8, %v982_v11  ;;  %v1020_v25 = vand.u32 4294901760, %v25_v13  ;;  %v20_v47 = vld [vmem:[%s1623_s1 + $0x18] sm:$0xff]  ;;  %v19_v54 = vld [vmem:[%s1623_s1 + $0x10] sm:$0xff]  ;;  %v18_v61 = vld [vmem:[%s1623_s1 + $0x8] sm:$0xff] }
   0x6   :  { %64 = vmatpush.msra.mxu0 %v965_v4  ;;  %205 = vmatpush.msra.mxu2 %v992_v14  ;;  %v104_v22 = vand.u32 4294901760, %v992_v14  ;;  %v1642_v23 = vand.u32 4294901760, %v995_v15  ;;  %v1640_v24 = vand.u32 4294901760, %v999_v16  ;;  %v1029_v29 = vsub.f32 %v26_v12, %v1001_v17  ;;  %v48_v59 = vld [vmem:[%s1623_s1 + $0xf8] sm:$0xff]  ;;  %v17_v2 = vld [vmem:[%s1623_s1] sm:$0xff]  ;;  %v47_v6 = vld [vmem:[%s1623_s1 + $0xf0] sm:$0xff] }
   0x7   :  { %260 = vmatpush.msra.mxu3 %v965_v4  ;;  %v1639_v27 = vand.u32 4294901760, %v1004_v18  ;;  %v1636_v28 = vand.u32 4294901760, %v1007_v19  ;;  %v1042_v33 = vand.u32 4294901760, %v24_v21  ;;  %v1045_v34 = vand.u32 4294901760, %v23_v26 }
   0x8   :  { %66 = vmatpush.msra.mxu0 %v967_v5  ;;  %208 = vmatpush.msra.mxu2 %v995_v15  ;;  %v105_v30 = vsub.f32 %v992_v14, %v104_v22  ;;  %v111_v31 = vsub.f32 %v995_v15, %v1642_v23  ;;  %v117_v32 = vsub.f32 %v999_v16, %v1640_v24  ;;  %v1634_v35 = vand.u32 4294901760, %v1010_v20 }
   0x9   :  { %262 = vmatpush.msra.mxu3 %v967_v5  ;;  %v123_v39 = vsub.f32 %v1004_v18, %v1639_v27  ;;  %v1057_v40 = vsub.f32 %v25_v13, %v1020_v25  ;;  %v129_v41 = vsub.f32 %v1007_v19, %v1636_v28  ;;  %v1067_v44 = vand.u32 4294901760, %v22_v36 }
   0xa   :  { %68 = vmatpush.msra.mxu0 %v978_v9  ;;  %v106_v37 = vand.u32 4294901760, %v105_v30  ;;  %211 = vmatpush.msra.mxu2 %v999_v16  ;;  %v112_v38 = vand.u32 4294901760, %v111_v31  ;;  %v118_v43 = vand.u32 4294901760, %v117_v32  ;;  %v1633_v45 = vand.u32 4294901760, %v1029_v29  ;;  %v46_v32 = vld [vmem:[%s1623_s1 + $0xe8] sm:$0xff] }
   0xb   :  { %264 = vmatpush.msra.mxu3 %v978_v9  ;;  %v1071_v46 = vsub.f32 %v24_v21, %v1042_v33  ;;  %v135_v48 = vsub.f32 %v1010_v20, %v1634_v35  ;;  %v124_v49 = vand.u32 4294901760, %v123_v39  ;;  %v1082_v50 = vand.u32 4294901760, %v21_v42 }
   0xc   :  { %70 = vmatpush.msra.mxu0 %v980_v10  ;;  %107 = vmatpush.msra.mxu1 %v106_v37  ;;  %v1632_v51 = vand.u32 4294901760, %v1057_v40  ;;  %v1086_v52 = vsub.f32 %v23_v26, %v1045_v34  ;;  %v1090_v53 = vand.u32 4294901760, %v20_v47  ;;  %v130_v55 = vand.u32 4294901760, %v129_v41 }
   0xd   :  { %214 = vmatpush.msra.mxu2 %v1004_v18  ;;  %266 = vmatpush.msra.mxu3 %v980_v10  ;;  %v141_v56 = vsub.f32 %v1029_v29, %v1633_v45  ;;  %v1631_v57 = vand.u32 4294901760, %v1071_v46  ;;  %v1101_v58 = vsub.f32 %v22_v36, %v1067_v44  ;;  %v136_v60 = vand.u32 4294901760, %v135_v48  ;;  %v41_v45 = vld [vmem:[%s1623_s1 + $0xc0] sm:$0xff] }
   0xe   :  { %72 = vmatpush.msra.mxu0 %v982_v11  ;;  %113 = vmatpush.msra.mxu1 %v112_v38  ;;  %v147_v62 = vsub.f32 %v1057_v40, %v1632_v51  ;;  %v1115_v63 = vand.u32 4294901760, %v19_v54  ;;  %v1630_v0 = vand.u32 4294901760, %v1086_v52  ;;  %v1119_v1 = vsub.f32 %v21_v42, %v1082_v50 }
   0xf   :  { %217 = vmatpush.msra.mxu2 %v1007_v19  ;;  %268 = vmatpush.msra.mxu3 %v982_v11  ;;  %v1130_v7 = vsub.f32 %v20_v47, %v1090_v53  ;;  %v1132_v8 = vand.u32 4294901760, %v48_v59  ;;  %v142_v12 = vand.u32 4294901760, %v141_v56  ;;  %v153_v13 = vsub.f32 %v1071_v46, %v1631_v57 }
  0x10   :  { %74 = vmatpush.msra.mxu0 %v1001_v17  ;;  %119 = vmatpush.msra.mxu1 %v118_v43  ;;  %v1138_v21 = vand.u32 4294901760, %v18_v61  ;;  %v1628_v26 = vand.u32 4294901760, %v1101_v58  ;;  %v1143_v30 = vand.u32 4294901760, %v17_v2  ;;  %v1145_v31 = vand.u32 4294901760, %v47_v6  ;;  %v45_v43 = vld [vmem:[%s1623_s1 + $0xe0] sm:$0xff] }
  0x11   :  { %220 = vmatpush.msra.mxu2 %v1010_v20  ;;  %270 = vmatpush.msra.mxu3 %v1001_v17  ;;  %v148_v36 = vand.u32 4294901760, %v147_v62  ;;  %v159_v37 = vsub.f32 %v1086_v52, %v1630_v0  ;;  %v1627_v38 = vand.u32 4294901760, %v1119_v1  ;;  %v1156_v39 = vsub.f32 %v19_v54, %v1115_v63 }
  0x12   :  { %76 = vmatpush.msra.mxu0 %v1020_v25  ;;  %125 = vmatpush.msra.mxu1 %v124_v49  ;;  %v1629_v41 = vand.u32 4294901760, %v1130_v7  ;;  %v1162_v42 = vsub.f32 %v48_v59, %v1132_v8  ;;  %v154_v47 = vand.u32 4294901760, %v153_v13  ;;  %v165_v48 = vsub.f32 %v1101_v58, %v1628_v26  ;;  %v44_v59 = vld [vmem:[%s1623_s1 + $0xd8] sm:$0xff]  ;;  %v43_v13 = vld [vmem:[%s1623_s1 + $0xd0] sm:$0xff] }
  0x13   :  { %223 = vmatpush.msra.mxu2 %v1029_v29  ;;  %272 = vmatpush.msra.mxu3 %v1020_v25  ;;  %v1172_v49 = vsub.f32 %v18_v61, %v1138_v21  ;;  %v1174_v54 = vand.u32 4294901760, %v46_v32  ;;  %v1182_v56 = vsub.f32 %v47_v6, %v1145_v31  ;;  %v171_v61 = vsub.f32 %v1119_v1, %v1627_v38 }
  0x14   :  { %78 = vmatpush.msra.mxu0 %v1042_v33  ;;  %131 = vmatpush.msra.mxu1 %v130_v55  ;;  %v1179_v55 = vsub.f32 %v17_v2, %v1143_v30  ;;  %v1635_v62 = vand.u32 4294901760, %v1156_v39  ;;  %v177_v2 = vsub.f32 %v1130_v7, %v1629_v41  ;;  %v1637_v6 = vand.u32 4294901760, %v1162_v42 }
  0x15   :  { %226 = vmatpush.msra.mxu2 %v1057_v40  ;;  %274 = vmatpush.msra.mxu3 %v1042_v33  ;;  %v1206_v38 = vsub.f32 %v46_v32, %v1174_v54  ;;  %v1208_v26 = vand.u32 4294901760, %v44_v59  ;;  %v1641_v0 = vand.u32 4294901760, %v1182_v56  ;;  %v1224_v51 = vand.u32 4294901760, %v43_v13 }
  0x16   :  { %80 = vmatpush.msra.mxu0 %v1045_v34  ;;  %137 = vmatpush.msra.mxu1 %v136_v60  ;;  %v160_v60 = vand.u32 4294901760, %v159_v37  ;;  %v1638_v37 = vand.u32 4294901760, %v1172_v49  ;;  %v1643_v41 = vand.u32 4294901760, %v1179_v55  ;;  %v183_v32 = vsub.f32 %v1156_v39, %v1635_v62 }
  0x17   :  { %229 = vmatpush.msra.mxu2 %v1071_v46  ;;  %276 = vmatpush.msra.mxu3 %v1045_v34  ;;  %v178_v35 = vand.u32 4294901760, %v177_v2  ;;  %v1240_v62 = vsub.f32 %v44_v59, %v1208_v26  ;;  %v40_v2 = vld [vmem:[%s1623_s1 + $0xb8] sm:$0xff]  ;;  %v1260_v24 = vsub.f32 %v43_v13, %v1224_v51 }
  0x18   :  { %82 = vmatpush.msra.mxu0 %v1067_v44  ;;  %143 = vmatpush.msra.mxu1 %v142_v12  ;;  %v1192_v12 = vand.u32 4294901760, %v45_v43  ;;  %v184_v59 = vand.u32 4294901760, %v183_v32  ;;  %v1265_v23 = vand.u32 4294901760, %v40_v2 }
  0x19   :  { %232 = vmatpush.msra.mxu2 %v1086_v52  ;;  %278 = vmatpush.msra.mxu3 %v1067_v44  ;;  %v1646_v14 = vand.u32 4294901760, %v1240_v62 }
  0x1a   :  { %84 = vmatpush.msra.mxu0 %v1082_v50  ;;  %149 = vmatpush.msra.mxu1 %v148_v36  ;;  %v166_v36 = vand.u32 4294901760, %v165_v48  ;;  %v172_v48 = vand.u32 4294901760, %v171_v61  ;;  %v1222_v57 = vsub.f32 %v45_v43, %v1192_v12  ;;  %v189_v43 = vsub.f32 %v1172_v49, %v1638_v37 }
  0x1b   :  { %235 = vmatpush.msra.mxu2 %v1101_v58  ;;  %280 = vmatpush.msra.mxu3 %v1082_v50  ;;  %v1644_v61 = vand.u32 4294901760, %v1206_v38  ;;  %v195_v37 = vsub.f32 %v1179_v55, %v1643_v41 }
  0x1c   :  { %86 = vmatpush.msra.mxu0 %v1090_v53  ;;  %155 = vmatpush.msra.mxu1 %v154_v47  ;;  %v42_v47 = vld [vmem:[%s1623_s1 + $0xc8] sm:$0xff]  ;;  %v1645_v27 = vand.u32 4294901760, %v1222_v57  ;;  %v190_v32 = vand.u32 4294901760, %v189_v43 }
  0x1d   :  { %238 = vmatpush.msra.mxu2 %v1119_v1  ;;  %282 = vmatpush.msra.mxu3 %v1090_v53  ;;  %v1242_v28 = vand.u32 4294901760, %v42_v47  ;;  %v458_v13 = vsub.f32 %v1206_v38, %v1644_v61  ;;  %v38_v43 = vld [vmem:[%s1623_s1 + $0xa8] sm:$0xff]  ;;  %v196_v61 = vand.u32 4294901760, %v195_v37 }
  0x1e   :  { %88 = vmatpush.msra.mxu0 %v1115_v63  ;;  %161 = vmatpush.msra.mxu1 %v160_v60  ;;  %v446_v60 = vsub.f32 %v1162_v42, %v1637_v6  ;;  %v1252_v6 = vand.u32 4294901760, %v41_v45 }
  0x1f   :  { %241 = vmatpush.msra.mxu2 %v1130_v7  ;;  %284 = vmatpush.msra.mxu3 %v1115_v63  ;;  %v459_v37 = vand.u32 4294901760, %v458_v13 }
  0x20   :  { %90 = vmatpush.msra.mxu0 %v1138_v21  ;;  %167 = vmatpush.msra.mxu1 %v166_v36  ;;  %v452_v36 = vsub.f32 %v1182_v56, %v1641_v0  ;;  %v447_v0 = vand.u32 4294901760, %v446_v60  ;;  %v1647_v60 = vand.u32 4294901760, %v995_v15 }
  0x21   :  { %244 = vmatpush.msra.mxu2 %v1156_v39  ;;  %286 = vmatpush.msra.mxu3 %v1138_v21 }
  0x22   :  { %92 = vmatpush.msra.mxu0 %v1143_v30  ;;  %173 = vmatpush.msra.mxu1 %v172_v48  ;;  %v39_v48 = vld [vmem:[%s1623_s1 + $0xb0] sm:$0xff]  ;;  %v453_v41 = vand.u32 4294901760, %v452_v36  ;;  %v1648_v36 = vand.u32 4294901760, %v999_v16  ;;  %v1307_v16 = vand.u32 4294901760, %v38_v43 }
  0x23   :  { %247 = vmatpush.msra.mxu2 %v1172_v49  ;;  %288 = vmatpush.msra.mxu3 %v1143_v30 }
  0x24   :  { %299 = vmatpush.msrb.mxu0 %v104_v22  ;;  %179 = vmatpush.msra.mxu1 %v178_v35  ;;  %v1276_v22 = vsub.f32 %v42_v47, %v1242_v28  ;;  %v1282_v35 = vsub.f32 %v41_v45, %v1252_v6  ;;  %v464_v47 = vsub.f32 %v1222_v57, %v1645_v27 }
  0x25   :  { %250 = vmatpush.msra.mxu2 %v1179_v55  ;;  %448 = vmatpush.msrb.mxu3 %v447_v0  ;;  %v1297_v45 = vsub.f32 %v40_v2, %v1265_v23  ;;  %v470_v27 = vsub.f32 %v1240_v62, %v1646_v14  ;;  %v1649_v0 = vand.u32 4294901760, %v1004_v18  ;;  %v1336_v2 = vsub.f32 %v38_v43, %v1307_v16 }
  0x26   :  { %303 = vmatpush.msrb.mxu0 %v1647_v60  ;;  %185 = vmatpush.msra.mxu1 %v184_v59  ;;  %v1292_v60 = vand.u32 4294901760, %v39_v48  ;;  %v37_v59 = vld [vmem:[%s1623_s1 + $0xa0] sm:$0xff]  ;;  %v465_v13 = vand.u32 4294901760, %v464_v47 }
  0x27   :  { %403 = vmatpush.msrb.mxu2 %v1132_v8  ;;  %454 = vmatpush.msrb.mxu3 %v453_v41  ;;  %v1322_v18 = vand.u32 4294901760, %v37_v59  ;;  %v1651_v41 = vand.u32 4294901760, %v1007_v19  ;;  %v471_v47 = vand.u32 4294901760, %v470_v27  ;;  %v35_v27 = vld [vmem:[%s1623_s1 + $0x90] sm:$0xff] }
  0x28   :  { %307 = vmatpush.msrb.mxu0 %v1648_v36  ;;  %191 = vmatpush.msra.mxu1 %v190_v32  ;;  %v36_v32 = vld [vmem:[%s1623_s1 + $0x98] sm:$0xff]  ;;  %v1650_v36 = vand.u32 4294901760, %v1260_v24  ;;  %v1320_v15 = vsub.f32 %v39_v48, %v1292_v60  ;;  %v1652_v48 = vand.u32 4294901760, %v1276_v22 }
  0x29   :  { %405 = vmatpush.msrb.mxu2 %v1145_v31  ;;  %460 = vmatpush.msrb.mxu3 %v459_v37  ;;  %v1338_v19 = vand.u32 4294901760, %v36_v32  ;;  %v1367_v37 = vand.u32 4294901760, %v35_v27 }
  0x2a   :  { %311 = vmatpush.msrb.mxu0 %v1649_v0  ;;  %197 = vmatpush.msra.mxu1 %v196_v61  ;;  %v476_v14 = vsub.f32 %v1260_v24, %v1650_v36  ;;  %v14_v61 = vld [vmem:[%s1625_s0] sm:$0xff]  ;;  %v482_v36 = vsub.f32 %v1276_v22, %v1652_v48  ;;  %v1352_v48 = vsub.f32 %v37_v59, %v1322_v18 }
  0x2b   :  { %407 = vmatpush.msrb.mxu2 %v1174_v54  ;;  %466 = vmatpush.msrb.mxu3 %v465_v13 }
  0x2c   :  { %315 = vmatpush.msrb.mxu0 %v1651_v41  ;;  %366 = vmatpush.msrb.mxu1 %v963_v3  ;;  %v1653_v3 = vand.u32 4294901760, %v1010_v20  ;;  %v1654_v41 = vand.u32 4294901760, %v1282_v35  ;;  %v477_v43 = vand.u32 4294901760, %v476_v14  ;;  %v1354_v20 = vand.u32 4294901760, %v14_v61  ;;  %v34_v14 = vld [vmem:[%s1623_s1 + $0x88] sm:$0xff] }
  0x2d   :  { %409 = vmatpush.msrb.mxu2 %v1192_v12  ;;  %472 = vmatpush.msrb.mxu3 %v471_v47  ;;  %v483_v59 = vand.u32 4294901760, %v482_v36  ;;  %v1658_v47 = vand.u32 4294901760, %v1320_v15 }
  0x2e   :  { %319 = vmatpush.msrb.mxu0 %v1653_v3  ;;  %368 = vmatpush.msrb.mxu1 %v965_v4  ;;  %v488_v0 = vsub.f32 %v1282_v35, %v1654_v41  ;;  %v1655_v4 = vand.u32 4294901760, %v1029_v29  ;;  %v1656_v3 = vand.u32 4294901760, %v1297_v45  ;;  %v1370_v29 = vsub.f32 %v36_v32, %v1338_v19 }
  0x2f   :  { %411 = vmatpush.msrb.mxu2 %v1208_v26  ;;  %478 = vmatpush.msrb.mxu3 %v477_v43  ;;  %v500_v36 = vsub.f32 %v1320_v15, %v1658_v47  ;;  %v1384_v13 = vsub.f32 %v14_v61, %v1354_v20  ;;  %v1660_v43 = vand.u32 4294901760, %v1336_v2  ;;  %v1397_v61 = vsub.f32 %v35_v27, %v1367_v37 }
  0x30   :  { %323 = vmatpush.msrb.mxu0 %v1655_v4  ;;  %370 = vmatpush.msrb.mxu1 %v967_v5  ;;  %v494_v41 = vsub.f32 %v1297_v45, %v1656_v3  ;;  %v1657_v5 = vand.u32 4294901760, %v1057_v40  ;;  %v489_v4 = vand.u32 4294901760, %v488_v0  ;;  %v33_v3 = vld [vmem:[%s1623_s1 + $0x80] sm:$0xff]  ;;  %v1386_v40 = vand.u32 4294901760, %v34_v14 }
  0x31   :  { %413 = vmatpush.msrb.mxu2 %v1224_v51  ;;  %484 = vmatpush.msrb.mxu3 %v483_v59  ;;  %v517_v47 = vand.u32 4294901760, %v1370_v29  ;;  %v1399_v32 = vand.u32 4294901760, %v33_v3 }
  0x32   :  { %327 = vmatpush.msrb.mxu0 %v1657_v5  ;;  %372 = vmatpush.msrb.mxu1 %v978_v9  ;;  %v1659_v9 = vand.u32 4294901760, %v1071_v46  ;;  %v495_v0 = vand.u32 4294901760, %v494_v41  ;;  %v506_v5 = vsub.f32 %v1336_v2, %v1660_v43  ;;  %v1661_v46 = vand.u32 4294901760, %v1086_v52 }
  0x33   :  { %415 = vmatpush.msrb.mxu2 %v1242_v28  ;;  %490 = vmatpush.msrb.mxu3 %v489_v4  ;;  %v1662_v41 = vand.u32 4294901760, %v1352_v48  ;;  %v1410_v27 = vsub.f32 %v34_v14, %v1386_v40  ;;  %v1663_v43 = vand.u32 4294901760, %v1101_v58  ;;  %v518_v52 = vsub.f32 %v1370_v29, %v517_v47 }
  0x34   :  { %331 = vmatpush.msrb.mxu0 %v1659_v9  ;;  %374 = vmatpush.msrb.mxu1 %v980_v10  ;;  %v501_v10 = vand.u32 4294901760, %v500_v36  ;;  %v95_v9 = vand.u32 4294901760, %v1384_v13  ;;  %v523_v4 = vand.u32 4294901760, %v1397_v61  ;;  %v1421_v36 = vsub.f32 %v33_v3, %v1399_v32 }
  0x35   :  { %417 = vmatpush.msrb.mxu2 %v1252_v6  ;;  %v512_v59 = vsub.f32 %v1352_v48, %v1662_v41  ;;  %496 = vmatpush.msrb.mxu3 %v495_v0  ;;  %v1664_v14 = vand.u32 4294901760, %v1119_v1  ;;  %v1665_v3 = vand.u32 4294901760, %v1130_v7  ;;  %v1666_v41 = vand.u32 4294901760, %v1156_v39 }
  0x36   :  { %335 = vmatpush.msrb.mxu0 %v1661_v46  ;;  %376 = vmatpush.msrb.mxu1 %v982_v11  ;;  %v507_v11 = vand.u32 4294901760, %v506_v5  ;;  %v96_v0 = vsub.f32 %v1384_v13, %v95_v9  ;;  %v529_v5 = vand.u32 4294901760, %v1410_v27  ;;  %v524_v1 = vsub.f32 %v1397_v61, %v523_v4 }
  0x37   :  { %419 = vmatpush.msrb.mxu2 %v1265_v23  ;;  %502 = vmatpush.msrb.mxu3 %v501_v10  ;;  %v513_v58 = vand.u32 4294901760, %v512_v59  ;;  %v535_v46 = vand.u32 4294901760, %v1421_v36  ;;  %v1667_v59 = vand.u32 4294901760, %v1172_v49 }
  0x38   :  { %339 = vmatpush.msrb.mxu0 %v1663_v43  ;;  %378 = vmatpush.msrb.mxu1 %v1001_v17  ;;  %v15_v17 = vld [vmem:[%s1625_s0 + $0x8] sm:$0xff]  ;;  %v530_v7 = vsub.f32 %v1410_v27, %v529_v5  ;;  %v525_v39 = vand.u32 4294901760, %v524_v1 }
  0x39   :  { %421 = vmatpush.msrb.mxu2 %v1292_v60  ;;  %508 = vmatpush.msrb.mxu3 %v507_v11  ;;  %v1440_v10 = vand.u32 4294901760, %v15_v17  ;;  %v1668_v11 = vand.u32 4294901760, %v1179_v55  ;;  %v1672_v55 = vand.u32 4294901760, %v1222_v57 }
  0x3a   :  { %343 = vmatpush.msrb.mxu0 %v1664_v14  ;;  %380 = vmatpush.msrb.mxu1 %v1020_v25  ;;  %v519_v25 = vand.u32 4294901760, %v518_v52 }
  0x3b   :  { %423 = vmatpush.msrb.mxu2 %v1307_v16  ;;  %514 = vmatpush.msrb.mxu3 %v513_v58  ;;  %v1457_v43 = vsub.f32 %v15_v17, %v1440_v10  ;;  %v933_v58 = vld [vmem:[%s1624_s2] ss:$0 sm:$0xff] }
  0x3c   :  { %347 = vmatpush.msrb.mxu0 %v1665_v3  ;;  %382 = vmatpush.msrb.mxu1 %v1042_v33  ;;  %v97_v33 = vand.u32 4294901760, %v96_v0 }
  0x3d   :  { %425 = vmatpush.msrb.mxu2 %v1322_v18  ;;  %520 = vmatpush.msrb.mxu3 %v519_v25  ;;  %v436_v52 = vand.u32 4294901760, %v1457_v43 }
  0x3e   :  { %351 = vmatpush.msrb.mxu0 %v1666_v41  ;;  %384 = vmatpush.msrb.mxu1 %v1045_v34  ;;  %v536_v34 = vsub.f32 %v1421_v36, %v535_v46 }
  0x3f   :  { %427 = vmatpush.msrb.mxu2 %v1338_v19  ;;  %98 = vmatmul.f32.vlgmr.msra.gmra.mxu0 %v97_v33 }
  0x40   :  { %355 = vmatpush.msrb.mxu0 %v1667_v59  ;;  %386 = vmatpush.msrb.mxu1 %v1067_v44  ;;  %v531_v44 = vand.u32 4294901760, %v530_v7  ;;  %v537_v49 = vand.u32 4294901760, %v536_v34 }
  0x41   :  { %429 = vmatpush.msrb.mxu2 %v1367_v37  ;;  %526 = vmatpush.msrb.mxu3 %v525_v39 }
  0x42   :  { %359 = vmatpush.msrb.mxu0 %v1668_v11  ;;  %388 = vmatpush.msrb.mxu1 %v1082_v50  ;;  %v1669_v50 = vand.u32 4294901760, %v1162_v42 }
  0x43   :  { %431 = vmatpush.msrb.mxu2 %v1386_v40  ;;  %532 = vmatpush.msrb.mxu3 %v531_v44 }
  0x44   :  { %546 = vmatpush.msra.mxu0 %v1162_v42  ;;  %390 = vmatpush.msrb.mxu1 %v1090_v53  ;;  %v437_v53 = vsub.f32 %v1457_v43, %v436_v52 }
  0x45   :  { %433 = vmatpush.msrb.mxu2 %v1399_v32  ;;  %538 = vmatpush.msrb.mxu3 %v537_v49 }
  0x46   :  { %549 = vmatpush.msra.mxu0 %v1182_v56  ;;  %392 = vmatpush.msrb.mxu1 %v1115_v63  ;;  %v1670_v63 = vand.u32 4294901760, %v1182_v56  ;;  %v438_v42 = vand.u32 4294901760, %v437_v53  ;;  %v1678_v56 = vand.u32 4294901760, %v1320_v15 }
  0x47   :  { %253 = vmatmul.f32.vlgmr.msra.gmra.mxu2 %v1384_v13  ;;  %292 = vmatmul.f32.vlgmr.msra.gmra.mxu3 %v95_v9 }
  0x48   :  { %552 = vmatpush.msra.mxu0 %v1206_v38  ;;  %640 = vmatpush.msra.mxu2 %v1669_v50 }
  0x49   :  { %394 = vmatpush.msrb.mxu1 %v1138_v21  ;;  %707 = vmatpush.msra.mxu3 %v1132_v8  ;;  %v1671_v21 = vand.u32 4294901760, %v1206_v38  ;;  %v1677_v38 = vand.u32 4294901760, %v1297_v45 }
  0x4a   :  { %555 = vmatpush.msra.mxu0 %v1222_v57  ;;  %644 = vmatpush.msra.mxu2 %v1670_v63  ;;  %v1674_v57 = vand.u32 4294901760, %v1260_v24 }
  0x4b   :  { %396 = vmatpush.msrb.mxu1 %v1143_v30  ;;  %709 = vmatpush.msra.mxu3 %v1145_v31  ;;  %v1673_v30 = vand.u32 4294901760, %v1240_v62 }
  0x4c   :  { %558 = vmatpush.msra.mxu0 %v1240_v62  ;;  %199 = vmatmul.f32.vlgmr.msra.gmra.mxu1 %v1354_v20 }
  0x4d   :  { %648 = vmatpush.msra.mxu2 %v1671_v21  ;;  %599 = vmatpush.msra.mxu1 %v1132_v8  ;;  %v1675_v8 = vand.u32 4294901760, %v1276_v22 }
  0x4e   :  { %561 = vmatpush.msra.mxu0 %v1260_v24  ;;  %711 = vmatpush.msra.mxu3 %v1174_v54  ;;  %v52_v24 = vld [vmem:[%s1623_s1 + $0x118] sm:$0xff] }
  0x4f   :  { %652 = vmatpush.msra.mxu2 %v1672_v55  ;;  %601 = vmatpush.msra.mxu1 %v1145_v31  ;;  %v1676_v31 = vand.u32 4294901760, %v1282_v35 }
  0x50   :  { %439 = vmatmul.f32.vlgmr.msrb.gmra.mxu2 %v438_v42  ;;  %564 = vmatpush.msra.mxu0 %v1276_v22  ;;  %v1679_v22 = vand.u32 4294901760, %v1336_v2 }
  0x51   :  { %603 = vmatpush.msra.mxu1 %v1174_v54  ;;  %656 = vmatpush.msra.mxu2 %v1673_v30  ;;  %v1530_v54 = vand.u32 4294901760, %v52_v24 }
  0x52   :  { %713 = vmatpush.msra.mxu3 %v1192_v12  ;;  %361 = vmatmul.f32.vlgmr.msrb.gmra.mxu0 %v1354_v20 }
  0x53   :  { %540 = vmatmul.f32.vlgmr.msrb.gmra.mxu3 %v1440_v10  ;;  %567 = vmatpush.msra.mxu0 %v1282_v35  ;;  %v1551_v35 = vsub.f32 %v52_v24, %v1530_v54 }
  0x54   :  { %605 = vmatpush.msra.mxu1 %v1192_v12  ;;  %660 = vmatpush.msra.mxu2 %v1674_v57 }
  0x55   :  { %715 = vmatpush.msra.mxu3 %v1208_v26  ;;  %398 = vmatmul.f32.vlgmr.msrb.gmra.mxu1 %v1354_v20 }
  0x56   :  { %570 = vmatpush.msra.mxu0 %v1297_v45  ;;  %607 = vmatpush.msra.mxu1 %v1208_v26  ;;  %v51_v26 = vld [vmem:[%s1623_s1 + $0x110] sm:$0xff] }
  0x57   :  { %664 = vmatpush.msra.mxu2 %v1675_v8  ;;  %717 = vmatpush.msra.mxu3 %v1224_v51  ;;  %v1540_v62 = vand.u32 4294901760, %v51_v26 }
  0x58   :  { %573 = vmatpush.msra.mxu0 %v1320_v15  ;;  %609 = vmatpush.msra.mxu1 %v1224_v51  ;;  %v16_v51 = vld [vmem:[%s1625_s0 + $0x10] sm:$0xff] }
  0x59   :  { %668 = vmatpush.msra.mxu2 %v1676_v31  ;;  %719 = vmatpush.msra.mxu3 %v1242_v28  ;;  %v59_v12 = vsel %vm57_vm0, %v16_v51, 0 }
  0x5a   :  { %576 = vmatpush.msra.mxu0 %v1336_v2  ;;  %611 = vmatpush.msra.mxu1 %v1242_v28  ;;  %v50_v28 = vld [vmem:[%s1623_s1 + $0x108] sm:$0xff]  ;;  %v1557_v45 = vand.u32 4294901760, %v59_v12  ;;  %v1563_v2 = vsub.f32 %v51_v26, %v1540_v62 }
  0x5b   :  { %672 = vmatpush.msra.mxu2 %v1677_v38  ;;  %721 = vmatpush.msra.mxu3 %v1252_v6  ;;  %v1553_v15 = vand.u32 4294901760, %v50_v28 }
  0x5c   :  { %579 = vmatpush.msra.mxu0 %v1352_v48  ;;  %613 = vmatpush.msra.mxu1 %v1252_v6  ;;  %v49_v6 = vld [vmem:[%s1623_s1 + $0x100] sm:$0xff]  ;;  %v764_v13 = vsub.f32 %v59_v12, %v1557_v45 }
  0x5d   :  { %676 = vmatpush.msra.mxu2 %v1678_v56  ;;  %723 = vmatpush.msra.mxu3 %v1265_v23  ;;  %v1565_v20 = vand.u32 4294901760, %v49_v6 }
  0x5e   :  { %582 = vmatpush.msra.mxu0 %v1370_v29  ;;  %615 = vmatpush.msra.mxu1 %v1265_v23  ;;  %v1680_v23 = vand.u32 4294901760, %v1352_v48  ;;  %v797_v48 = vsub.f32 %v50_v28, %v1553_v15 }
  0x5f   :  { %680 = vmatpush.msra.mxu2 %v1679_v22  ;;  %725 = vmatpush.msra.mxu3 %v1292_v60  ;;  %v803_v29 = vsub.f32 %v49_v6, %v1565_v20 }
  0x60   :  { %585 = vmatpush.msra.mxu0 %v1397_v61  ;;  %617 = vmatpush.msra.mxu1 %v1292_v60  ;;  %v786_v60 = vand.u32 4294901760, %v1551_v35  ;;  %v765_v61 = vand.u32 4294901760, %v764_v13 }
  0x61   :  { %684 = vmatpush.msra.mxu2 %v1680_v23  ;;  %727 = vmatpush.msra.mxu3 %v1307_v16  ;;  %v804_v9 = vand.u32 4294901760, %v803_v29 }
  0x62   :  { %588 = vmatpush.msra.mxu0 %v1410_v27  ;;  %619 = vmatpush.msra.mxu1 %v1307_v16  ;;  %v792_v16 = vand.u32 4294901760, %v1563_v2 }
  0x63   :  { %688 = vmatpush.msra.mxu2 %v517_v47  ;;  %729 = vmatpush.msra.mxu3 %v1322_v18  ;;  %v798_v47 = vand.u32 4294901760, %v797_v48  ;;  %v805_v14 = vsub.f32 %v803_v29, %v804_v9 }
  0x64   :  { %591 = vmatpush.msra.mxu0 %v1421_v36  ;;  %621 = vmatpush.msra.mxu1 %v1322_v18  ;;  %v787_v18 = vsub.f32 %v1551_v35, %v786_v60 }
  0x65   :  { %692 = vmatpush.msra.mxu2 %v523_v4  ;;  %731 = vmatpush.msra.mxu3 %v1338_v19  ;;  %v799_v27 = vsub.f32 %v797_v48, %v798_v47  ;;  %v766_v4 = vsub.f32 %v764_v13, %v765_v61  ;;  %v806_v17 = vand.u32 4294901760, %v805_v14 }
  0x66   :  { %594 = vmatmul.f32.vlgmr.msra.gmra.mxu0 %v1457_v43  ;;  %623 = vmatpush.msra.mxu1 %v1338_v19  ;;  %v793_v19 = vsub.f32 %v1563_v2, %v792_v16 }
  0x67   :  { %696 = vmatpush.msra.mxu2 %v529_v5  ;;  %733 = vmatpush.msra.mxu3 %v1367_v37 }
  0x68   :  { %625 = vmatpush.msra.mxu1 %v1367_v37  ;;  %756 = vmatpush.msrb.mxu0 %v1530_v54  ;;  %v788_v37 = vand.u32 4294901760, %v787_v18  ;;  %v794_v36 = vand.u32 4294901760, %v793_v19 }
  0x69   :  { %700 = vmatpush.msra.mxu2 %v535_v46  ;;  %735 = vmatpush.msra.mxu3 %v1386_v40 }
  0x6a   :  { %702 = vmatmul.f32.vlgmr.msra.gmra.mxu2 %v1440_v10  ;;  %627 = vmatpush.msra.mxu1 %v1386_v40  ;;  %v800_v40 = vand.u32 4294901760, %v799_v27 }
  0x6b   :  { %827 = vmatpush.msrb.mxu2 %v1551_v35  ;;  %737 = vmatpush.msra.mxu3 %v1399_v32 }
  0x6c   :  { %739 = vmatmul.f32.vlgmr.msra.gmra.mxu3 %v1440_v10  ;;  %629 = vmatpush.msra.mxu1 %v1399_v32  ;;  %v767_v32 = vand.u32 4294901760, %v766_v4 }
  0x6d   :  { %830 = vmatpush.msrb.mxu2 %v1563_v2  ;;  %856 = vmatpush.msrb.mxu3 %v1530_v54 }
  0x6e   :  { %633 = vmatmul.f32.vlgmr.msra.gmra.mxu1 %v436_v52  ;;  %758 = vmatpush.msrb.mxu0 %v1540_v62 }
  0x6f   :  { %789 = vmatpush.msrb.mxu1 %v788_v37  ;;  %833 = vmatpush.msrb.mxu2 %v797_v48 }
  0x70   :  { %858 = vmatpush.msrb.mxu3 %v1540_v62  ;;  %760 = vmatpush.msrb.mxu0 %v1553_v15 }
  0x71   :  { %795 = vmatpush.msrb.mxu1 %v794_v36  ;;  %836 = vmatpush.msrb.mxu2 %v803_v29 }
  0x72   :  { %860 = vmatpush.msrb.mxu3 %v1553_v15  ;;  %762 = vmatpush.msrb.mxu0 %v1565_v20 }
  0x73   :  { %801 = vmatpush.msrb.mxu1 %v800_v40  ;;  %839 = vmatmul.f32.vlgmr.msrb.gmra.mxu2 %v764_v13 }
  0x74   :  { %862 = vmatpush.msrb.mxu3 %v1565_v20  ;;  %768 = vmatmul.f32.vlgmr.msrb.gmra.mxu0 %v767_v32 }
  0x75   :  { %807 = vmatpush.msrb.mxu1 %v806_v17  ;;  %866 = vmatmul.f32.vlgmr.msrb.gmra.mxu3 %v765_v61 }
  0x76   :  { %885 = vmatpush.msra.mxu0 %v786_v60  ;;  %809 = vmatmul.f32.vlgmr.msrb.gmra.mxu1 %v1557_v45 }
  0x77   :  { %916 = vmatpush.msra.mxu1 %v1530_v54 }
  0x78   :  { %889 = vmatpush.msra.mxu0 %v792_v16 }
  0x79   :  { %918 = vmatpush.msra.mxu1 %v1540_v62 }
  0x7a   :  { %893 = vmatpush.msra.mxu0 %v798_v47 }
  0x7b   :  { %920 = vmatpush.msra.mxu1 %v1553_v15 }
  0x7c   :  { %897 = vmatpush.msra.mxu0 %v804_v9 }
  0x7d   :  { %899 = vmatmul.f32.vlgmr.msra.gmra.mxu0 %v1557_v45  ;;  %922 = vmatpush.msra.mxu1 %v1565_v20 }
  0x7e   :  { %924 = vmatmul.f32.vlgmr.msra.gmra.mxu1 %v1557_v45 }
  0xbc   :  { %v99_v0 = vpop.f32.mrf.mxu0 }
  0xbd   :  { %v100_v5 = vadd.f32 %v933_v58, %v99_v0 }
  0xc9   :  { %v200_v3 = vpop.f32.mrf.mxu1 }
  0xca   :  { %v201_v25 = vadd.f32 %v200_v3, %v100_v5  ;;  %v254_v1 = vpop.f32.mrf.mxu2  ;;  %v293_v10 = vpop.f32.mrf.mxu3 }
  0xcc   :  { %v255_v46 = vadd.f32 %v254_v1, %v201_v25 }
  0xce   :  { %v294_v41 = vadd.f32 %v293_v10, %v255_v46 }
  0xcf   :  { %v362_v33 = vpop.f32.mrf.mxu0 }
  0xd0   :  { %v363_v7 = vadd.f32 %v362_v33, %v294_v41 }
  0xd2   :  { %v399_v59 = vpop.f32.mrf.mxu1 }
  0xd3   :  { %v400_v39 = vadd.f32 %v399_v59, %v363_v7  ;;  %v440_v34 = vpop.f32.mrf.mxu2 }
  0xd5   :  { %v441_v43 = vadd.f32 %v440_v34, %v400_v39 }
  0xd6   :  { %v541_v11 = vpop.f32.mrf.mxu3 }
  0xd7   :  { %v542_v49 = vadd.f32 %v541_v11, %v441_v43 }
  0xe3   :  { %v595_v44 = vpop.f32.mrf.mxu0 }
  0xe4   :  { %v596_v52 = vadd.f32 %v595_v44, %v542_v49 }
  0xeb   :  { %v634_v50 = vpop.f32.mrf.mxu1 }
  0xec   :  { %v635_v53 = vadd.f32 %v634_v50, %v596_v52 }
  0xed   :  { %v703_v63 = vpop.f32.mrf.mxu2 }
  0xee   :  { %v704_v21 = vadd.f32 %v703_v63, %v635_v53 }
  0xef   :  { %v740_v42 = vpop.f32.mrf.mxu3 }
  0xf0   :  { %v741_v55 = vadd.f32 %v740_v42, %v704_v21 }
  0xf1   :  { %v769_v30 = vpop.f32.mrf.mxu0 }
  0xf2   :  { %v770_v57 = vadd.f32 %v769_v30, %v741_v55 }
  0xf3   :  { %v810_v8 = vpop.f32.mrf.mxu1 }
  0xf4   :  { %v811_v24 = vadd.f32 %v810_v8, %v770_v57 }
  0xf6   :  { %v840_v31 = vpop.f32.mrf.mxu2 }
  0xf7   :  { %v841_v26 = vadd.f32 %v840_v31, %v811_v24 }
  0xf8   :  { %v867_v51 = vpop.f32.mrf.mxu3 }
  0xf9   :  { %v868_v38 = vadd.f32 %v867_v51, %v841_v26 }
  0xfa   :  { %v900_v54 = vpop.f32.mrf.mxu0 }
  0xfb   :  { %v901_v28 = vadd.f32 %v900_v54, %v868_v38  ;;  %v925_v56 = vpop.f32.mrf.mxu1 }
  0xfd   :  { %v926_v62 = vadd.f32 %v925_v56, %v901_v28 }
  0xff   :  { %928 = vst [vmem:[%s1626_s3] sm:$0xff] %v926_v62 }

</bundles_post_ra>
